<compile_context>
chip_gen: v5e
topology: v5e:2x2
jax: 0.10.0
libtpu: 0.0.40
codegen_flags: <defaults>
</compile_context>

<pallas_src>
import functools

import jax
import jax.numpy as jnp
from jax.experimental import pallas as pl
from jax.experimental.pallas import tpu as pltpu

LANE = 128      # f32 lane width
SUBLANE = 8     # f32 sublane count
VMEM_TARGET_BYTES = 48 << 20   # conservative budget, fits v7x's 64 MiB VMEM


def _round_up(n, m):
    return ((n + m - 1) // m) * m


# ----------------------------- fused kernel ----------------------------------

def _fused_mlp_kernel(*refs, num_layers, out_valid, neg_slope):
    """refs = (x_ref, w_1..w_L, bias_pack_ref, o_ref).

    x_ref:   (BT, Din_pad)
    w_l:     (Din_pad_l, Dout_pad_l)    pre-transposed, zero-padded
    bias:    (L, max_Dout_pad)          all biases packed, f32
    o_ref:   (BT, Dout_pad_L)
    """
    x_ref = refs[0]
    w_refs = refs[1:1 + num_layers]
    b_ref = refs[1 + num_layers]
    o_ref = refs[-1]

    h = x_ref[...].astype(jnp.float32)
    for l in range(num_layers):                      # unrolled at trace time
        w = w_refs[l][...]
        dout_p = w.shape[1]
        b = b_ref[l:l + 1, :dout_p]                  # (1, dout_p) static slice
        # MXU matmul with f32 accumulation (inputs may be bf16), bias on VPU.
        y = jnp.dot(h.astype(w.dtype), w, preferred_element_type=jnp.float32) + b
        # PyTorch LeakyReLU(negative_slope=-0.1): x if x >= 0 else -0.1 * x
        # (sign flip for negatives matches the module as written).
        h = jnp.where(y >= 0, y, neg_slope * y)

    # LogSoftmax over the feature axis; only the first `out_valid` lanes are
    # real classes -- mask padded lanes to -inf for the reductions only.
    lane_idx = jax.lax.broadcasted_iota(jnp.int32, h.shape, 1)
    hm = jnp.where(lane_idx < out_valid, h, jnp.float32(-jnp.inf))
    m = jnp.max(hm, axis=1, keepdims=True)
    lse = jnp.log(jnp.sum(jnp.exp(hm - m), axis=1, keepdims=True))   # EUP ops
    # Use unmasked h for the store: real lanes identical to the masked result,
    # padded lanes stay FINITE (safe for consumers of the padded buffer).
    o_ref[...] = (h - (m + lse)).astype(o_ref.dtype)                 # lane-dense


# ----------------------------- parameter init --------------------------------

def init_params(architecture, key, weight_dtype=jnp.float32):
    """Xavier-uniform weights (like torch.nn.init.xavier_uniform_), PyTorch
    default uniform bias init.  Weights are stored PRE-TRANSPOSED as
    (Din_pad, Dout_pad), zero-padded to 128-lane multiples, optionally in
    bf16.  All biases are packed into one (L, max_Dout_pad) f32 array."""
    weights, biases = [], []
    for idx in range(len(architecture) - 1):
        fan_in, fan_out = architecture[idx], architecture[idx + 1]
        key, kw, kb = jax.random.split(key, 3)
        limit = jnp.sqrt(6.0 / (fan_in + fan_out))
        w = jax.random.uniform(kw, (fan_in, fan_out), jnp.float32, -limit, limit)
        bbound = 1.0 / jnp.sqrt(float(fan_in))
        b = jax.random.uniform(kb, (fan_out,), jnp.float32, -bbound, bbound)

        din_p, dout_p = _round_up(fan_in, LANE), _round_up(fan_out, LANE)
        w_p = (jnp.zeros((din_p, dout_p), jnp.float32)
               .at[:fan_in, :fan_out].set(w).astype(weight_dtype))
        b_p = jnp.zeros((dout_p,), jnp.float32).at[:fan_out].set(b)
        weights.append(w_p)
        biases.append(b_p)

    max_dout = max(b.shape[0] for b in biases)
    bias_pack = jnp.zeros((len(biases), max_dout), jnp.float32)
    for l, b in enumerate(biases):
        bias_pack = bias_pack.at[l, :b.shape[0]].set(b)
    return tuple(weights), bias_pack


# ----------------------------- forward wrapper --------------------------------

@functools.partial(
    jax.jit, static_argnames=("out_dim", "neg_slope", "single_buffer_weights"))
def full_network_forward(x, weights, bias_pack, out_dim, neg_slope=-0.1,
                         single_buffer_weights=True):
    """x: (B, Din) or pre-padded (B, Din_pad); weights: tuple of padded
    (Din_pad, Dout_pad) arrays; bias_pack: (L, max_Dout_pad) f32.
    Returns (B, out_dim) log-probabilities."""
    B, Din = x.shape
    num_layers = len(weights)
    din_pad = weights[0].shape[0]
    dout_pad = weights[-1].shape[1]

    # ---- batch tiling: >=2 grid steps when possible (v7x megacore), cap 1024.
    b_pad0 = _round_up(B, SUBLANE)
    cap = 1024
    min_steps = 2 if b_pad0 > SUBLANE else 1
    steps = max(min_steps, pl.cdiv(b_pad0, cap))
    bt = min(_round_up(pl.cdiv(b_pad0, steps), SUBLANE), cap)

    # ---- VMEM budget: resident params (single-buffered) + pipelined x/out
    #      blocks + activation temps.  Shrink bt until it fits the target.
    wbuf = 1 if single_buffer_weights else 2
    param_bytes = (sum(w.size * w.dtype.itemsize for w in weights)
                   + bias_pack.size * bias_pack.dtype.itemsize) * wbuf
    max_dout_any = max(w.shape[1] for w in weights)

    def _budget(bt_):
        io = 2 * bt_ * (din_pad + dout_pad) * 4          # double-buffered x/out
        temps = 4 * bt_ * max_dout_any * 4               # f32 activation temps
        return param_bytes + io + temps

    while _budget(bt) > VMEM_TARGET_BYTES and bt > SUBLANE:
        bt = max(SUBLANE, _round_up(bt // 2, SUBLANE))

    b_pad = _round_up(b_pad0, bt)

    # ---- pad input only when not already padded at data-load time.
    if x.shape != (b_pad, din_pad):
        x = jnp.zeros((b_pad, din_pad), x.dtype).at[:B, :Din].set(x)

    kernel = functools.partial(
        _fused_mlp_kernel,
        num_layers=num_layers,
        out_valid=out_dim,
        neg_slope=neg_slope,
    )

    # ---- BlockSpecs: resident (constant index_map) params, single-buffered.
    wkw = {"pipeline_mode": pl.Buffered(1)} if single_buffer_weights else {}
    in_specs = [pl.BlockSpec((bt, din_pad), lambda i: (i, 0))]
    for w in weights:
        in_specs.append(pl.BlockSpec(w.shape, lambda i: (0, 0), **wkw))
    in_specs.append(pl.BlockSpec(bias_pack.shape, lambda i: (0, 0), **wkw))

    # ---- scheduler hint.
    flops = 2 * b_pad * sum(w.shape[0] * w.shape[1] for w in weights)
    transcendentals = b_pad * dout_pad + b_pad           # exp per lane + log/row
    bytes_accessed = (x.size * x.dtype.itemsize
                      + sum(w.size * w.dtype.itemsize for w in weights)
                      + bias_pack.size * bias_pack.dtype.itemsize
                      + b_pad * dout_pad * x.dtype.itemsize)

    vmem_limit = int(min(56 << 20, max(2 * _budget(bt), 32 << 20)))

    out_p = pl.pallas_call(
        kernel,
        out_shape=jax.ShapeDtypeStruct((b_pad, dout_pad), x.dtype),
        grid=(b_pad // bt,),
        in_specs=in_specs,
        out_specs=pl.BlockSpec((bt, dout_pad), lambda i: (i, 0)),
        compiler_params=pltpu.CompilerParams(
            dimension_semantics=("parallel",),
            vmem_limit_bytes=vmem_limit,
        ),
        cost_estimate=pl.CostEstimate(
            flops=flops,
            transcendentals=transcendentals,
            bytes_accessed=bytes_accessed,
        ),
    )(x, *weights, bias_pack)

    # Padded lanes are finite, so a downstream consumer could also take the
    # padded buffer directly and fuse this slice.
    return out_p[:B, :out_dim]


# ----------------------------- main -------------------------------------------

if __name__ == "__main__":
    architecture = [32, 64, 16]   # small MLP: 32 -> 64 -> 16
    batch = 8

    key = jax.random.PRNGKey(0)
    key, kx = jax.random.split(key)
    x = jax.random.normal(kx, (batch, architecture[0]), jnp.float32)

    weights_f32, bias_pack = init_params(architecture, key, weight_dtype=jnp.float32)
    weights_bf16 = tuple(w.astype(jnp.bfloat16) for w in weights_f32)

    # Pad the feature axis ONCE at data-load time so the jitted forward does
    # not spend an extra HBM pass padding the activations per call.
    din_pad = weights_f32[0].shape[0]
    x_padded = jnp.zeros((batch, din_pad), jnp.float32).at[:, :architecture[0]].set(x)

    def run(xp, ws, bp):
        try:
            out = full_network_forward(xp, ws, bp, out_dim=architecture[-1],
                                       single_buffer_weights=True)
        except Exception:
            # Fallback if this JAX build rejects single-buffered param specs.
            out = full_network_forward(xp, ws, bp, out_dim=architecture[-1],
                                       single_buffer_weights=False)
        return jax.block_until_ready(out)

    out_f32 = run(x_padded, weights_f32, bias_pack)
    out_bf16 = run(x_padded, weights_bf16, bias_pack)   # bf16-weight fast path

    # --- reference (plain JAX, full precision) ---
    def ref_forward(xv, ws, bp, arch):
        h = xv
        for l, (fin, fout) in enumerate(zip(arch[:-1], arch[1:])):
            w = ws[l].astype(jnp.float32)[:fin, :fout]
            b = bp[l, :fout]
            y = jnp.dot(h, w, precision=jax.lax.Precision.HIGHEST) + b
            h = jnp.where(y >= 0, y, -0.1 * y)
        return jax.nn.log_softmax(h, axis=1)

    ref_f32 = ref_forward(x, weights_f32, bias_pack, architecture)
    ref_bf16 = ref_forward(x, weights_bf16, bias_pack, architecture)

    assert out_f32.shape == (batch, architecture[-1])
    assert out_bf16.shape == (batch, architecture[-1])
    assert bool(jnp.max(jnp.abs(out_f32 - ref_f32)) < 2e-3)
    assert bool(jnp.max(jnp.abs(out_bf16 - ref_bf16)) < 5e-2)
    row_sums = jnp.sum(jnp.exp(out_f32), axis=1)
    assert bool(jnp.all(jnp.abs(row_sums - 1.0) < 1e-4))

    print("KERNEL_OK")
</pallas_src>

<mosaic_0001>
module attributes {stable_mosaic.version = 11 : i64} {
  func.func @_fused_mlp_kernel(%arg0: i32, %arg1: memref<8x128xf32, #tpu.memory_space<vmem>>, %arg2: memref<128x128xf32, #tpu.memory_space<vmem>>, %arg3: memref<128x128xf32, #tpu.memory_space<vmem>>, %arg4: memref<2x128xf32, #tpu.memory_space<vmem>>, %arg5: memref<8x128xf32, #tpu.memory_space<vmem>>) attributes {dimension_semantics = [#tpu.dimension_semantics<parallel>], iteration_bounds = array<i64: 1>, scalar_prefetch = 0 : i64, scratch_operands = 0 : i64, tpu.core_type = #tpu.core_type<tc>, window_params = [{transform_indices = @transform_0, window_bounds = array<i64: 8, 128>}, {pipeline_mode = #tpu.pipeline_mode<synchronous>, transform_indices = @transform_1, window_bounds = array<i64: 128, 128>}, {pipeline_mode = #tpu.pipeline_mode<synchronous>, transform_indices = @transform_2, window_bounds = array<i64: 128, 128>}, {pipeline_mode = #tpu.pipeline_mode<synchronous>, transform_indices = @transform_3, window_bounds = array<i64: 2, 128>}, {transform_indices = @transform_4, window_bounds = array<i64: 8, 128>}]} {
    %c0 = arith.constant 0 : index
    %c0_0 = arith.constant 0 : index
    %0 = vector.load %arg1[%c0, %c0_0] : memref<8x128xf32, #tpu.memory_space<vmem>>, vector<8x128xf32>
    %c0_1 = arith.constant 0 : index
    %c0_2 = arith.constant 0 : index
    %1 = vector.load %arg2[%c0_1, %c0_2] : memref<128x128xf32, #tpu.memory_space<vmem>>, vector<128x128xf32>
    %c0_3 = arith.constant 0 : index
    %c0_4 = arith.constant 0 : index
    %2 = vector.load %arg4[%c0_3, %c0_4] : memref<2x128xf32, #tpu.memory_space<vmem>>, vector<1x128xf32>
    %cst = arith.constant dense<0.000000e+00> : vector<8x128xf32>
    %3 = tpu.matmul %0, %1, %cst {dimension_numbers = #tpu.dot_dimension_numbers<[1], [0], [0], [1], [0, 0, 1, 1], [], []>} : vector<8x128xf32>, vector<128x128xf32>, vector<8x128xf32> -> vector<8x128xf32>
    %4 = vector.broadcast %2 : vector<1x128xf32> to vector<8x128xf32>
    %5 = arith.addf %3, %4 : vector<8x128xf32>
    %cst_5 = arith.constant 0.000000e+00 : f32
    %6 = vector.broadcast %cst_5 : f32 to vector<8x128xf32>
    %7 = arith.cmpf oge, %5, %6 : vector<8x128xf32>
    %cst_6 = arith.constant -1.000000e-01 : f32
    %8 = vector.broadcast %cst_6 : f32 to vector<8x128xf32>
    %9 = arith.mulf %8, %5 : vector<8x128xf32>
    %10 = arith.select %7, %5, %9 : vector<8x128xi1>, vector<8x128xf32>
    %c0_7 = arith.constant 0 : index
    %c0_8 = arith.constant 0 : index
    %11 = vector.load %arg3[%c0_7, %c0_8] : memref<128x128xf32, #tpu.memory_space<vmem>>, vector<128x128xf32>
    %c1 = arith.constant 1 : index
    %c0_9 = arith.constant 0 : index
    %12 = vector.load %arg4[%c1, %c0_9] : memref<2x128xf32, #tpu.memory_space<vmem>>, vector<1x128xf32>
    %cst_10 = arith.constant dense<0.000000e+00> : vector<8x128xf32>
    %13 = tpu.matmul %10, %11, %cst_10 {dimension_numbers = #tpu.dot_dimension_numbers<[1], [0], [0], [1], [0, 0, 1, 1], [], []>} : vector<8x128xf32>, vector<128x128xf32>, vector<8x128xf32> -> vector<8x128xf32>
    %14 = vector.broadcast %12 : vector<1x128xf32> to vector<8x128xf32>
    %15 = arith.addf %13, %14 : vector<8x128xf32>
    %cst_11 = arith.constant 0.000000e+00 : f32
    %16 = vector.broadcast %cst_11 : f32 to vector<8x128xf32>
    %17 = arith.cmpf oge, %15, %16 : vector<8x128xf32>
    %cst_12 = arith.constant -1.000000e-01 : f32
    %18 = vector.broadcast %cst_12 : f32 to vector<8x128xf32>
    %19 = arith.mulf %18, %15 : vector<8x128xf32>
    %20 = arith.select %17, %15, %19 : vector<8x128xi1>, vector<8x128xf32>
    %21 = tpu.iota {dimensions = array<i32: 1>} : vector<8x128xi32>
    %c16_i32 = arith.constant 16 : i32
    %22 = vector.broadcast %c16_i32 : i32 to vector<8x128xi32>
    %23 = arith.cmpi slt, %21, %22 : vector<8x128xi32>
    %cst_13 = arith.constant 0xFF800000 : f32
    %24 = vector.broadcast %cst_13 : f32 to vector<8x128xf32>
    %25 = arith.select %23, %20, %24 : vector<8x128xi1>, vector<8x128xf32>
    %cst_14 = arith.constant dense<0xFF800000> : vector<8xf32>
    %26 = vector.multi_reduction <maximumf>, %25, %cst_14 [1] : vector<8x128xf32> to vector<8xf32>
    %27 = vector.shape_cast %26 : vector<8xf32> to vector<8x1xf32>
    %28 = vector.broadcast %27 : vector<8x1xf32> to vector<8x128xf32>
    %29 = arith.subf %25, %28 : vector<8x128xf32>
    %30 = math.exp %29 : vector<8x128xf32>
    %cst_15 = arith.constant dense<0.000000e+00> : vector<8xf32>
    %31 = vector.multi_reduction <add>, %30, %cst_15 [1] : vector<8x128xf32> to vector<8xf32>
    %32 = vector.shape_cast %31 : vector<8xf32> to vector<8x1xf32>
    %33 = math.log %32 : vector<8x1xf32>
    %34 = arith.addf %27, %33 : vector<8x1xf32>
    %35 = vector.broadcast %34 : vector<8x1xf32> to vector<8x128xf32>
    %36 = arith.subf %20, %35 : vector<8x128xf32>
    %c0_16 = arith.constant 0 : index
    %c0_17 = arith.constant 0 : index
    %37 = vector.load %arg5[%c0_16, %c0_17] : memref<8x128xf32, #tpu.memory_space<vmem>>, vector<8x128xf32>
    tpu.vector_store %arg5[%c0_16, %c0_17], %36 {strides = array<i32>} : memref<8x128xf32, #tpu.memory_space<vmem>>, vector<8x128xf32>,
    return
  }
  func.func @transform_0(%arg0: i32) -> (i32, i32) {
    %c0_i32 = arith.constant 0 : i32
    %c0_i32_0 = arith.constant 0 : i32
    return %arg0, %c0_i32 : i32, i32
  }
  func.func @transform_1(%arg0: i32) -> (i32, i32) {
    %c0_i32 = arith.constant 0 : i32
    %c0_i32_0 = arith.constant 0 : i32
    %c0_i32_1 = arith.constant 0 : i32
    return %c0_i32, %c0_i32_0 : i32, i32
  }
  func.func @transform_2(%arg0: i32) -> (i32, i32) {
    %c0_i32 = arith.constant 0 : i32
    %c0_i32_0 = arith.constant 0 : i32
    %c0_i32_1 = arith.constant 0 : i32
    return %c0_i32, %c0_i32_0 : i32, i32
  }
  func.func @transform_3(%arg0: i32) -> (i32, i32) {
    %c0_i32 = arith.constant 0 : i32
    %c0_i32_0 = arith.constant 0 : i32
    %c0_i32_1 = arith.constant 0 : i32
    return %c0_i32, %c0_i32_0 : i32, i32
  }
  func.func @transform_4(%arg0: i32) -> (i32, i32) {
    %c0_i32 = arith.constant 0 : i32
    %c0_i32_0 = arith.constant 0 : i32
    return %arg0, %c0_i32 : i32, i32
  }
}

module attributes {stable_mosaic.version = 11 : i64} {
  func.func @_fused_mlp_kernel(%arg0: i32, %arg1: memref<8x128xf32, #tpu.memory_space<vmem>>, %arg2: memref<128x128xf32, #tpu.memory_space<vmem>>, %arg3: memref<128x128xf32, #tpu.memory_space<vmem>>, %arg4: memref<2x128xf32, #tpu.memory_space<vmem>>, %arg5: memref<8x128xf32, #tpu.memory_space<vmem>>) attributes {dimension_semantics = [#tpu.dimension_semantics<parallel>], iteration_bounds = array<i64: 1>, scalar_prefetch = 0 : i64, scratch_operands = 0 : i64, tpu.core_type = #tpu.core_type<tc>, window_params = [{transform_indices = @transform_0, window_bounds = array<i64: 8, 128>}, {pipeline_mode = #tpu.pipeline_mode<synchronous>, transform_indices = @transform_1, window_bounds = array<i64: 128, 128>}, {pipeline_mode = #tpu.pipeline_mode<synchronous>, transform_indices = @transform_2, window_bounds = array<i64: 128, 128>}, {pipeline_mode = #tpu.pipeline_mode<synchronous>, transform_indices = @transform_3, window_bounds = array<i64: 2, 128>}, {transform_indices = @transform_4, window_bounds = array<i64: 8, 128>}]} {
    %c0 = arith.constant 0 : index
    %c0_0 = arith.constant 0 : index
    %0 = vector.load %arg1[%c0, %c0_0] : memref<8x128xf32, #tpu.memory_space<vmem>>, vector<8x128xf32>
    %c0_1 = arith.constant 0 : index
    %c0_2 = arith.constant 0 : index
    %1 = vector.load %arg2[%c0_1, %c0_2] : memref<128x128xf32, #tpu.memory_space<vmem>>, vector<128x128xf32>
    %c0_3 = arith.constant 0 : index
    %c0_4 = arith.constant 0 : index
    %2 = vector.load %arg4[%c0_3, %c0_4] : memref<2x128xf32, #tpu.memory_space<vmem>>, vector<1x128xf32>
    %cst = arith.constant dense<0.000000e+00> : vector<8x128xf32>
    %3 = tpu.matmul %0, %1, %cst {dimension_numbers = #tpu.dot_dimension_numbers<[1], [0], [0], [1], [0, 0, 1, 1], [], []>} : vector<8x128xf32>, vector<128x128xf32>, vector<8x128xf32> -> vector<8x128xf32>
    %4 = vector.broadcast %2 : vector<1x128xf32> to vector<8x128xf32>
    %5 = arith.addf %3, %4 : vector<8x128xf32>
    %cst_5 = arith.constant 0.000000e+00 : f32
    %6 = vector.broadcast %cst_5 : f32 to vector<8x128xf32>
    %7 = arith.cmpf oge, %5, %6 : vector<8x128xf32>
    %cst_6 = arith.constant -1.000000e-01 : f32
    %8 = vector.broadcast %cst_6 : f32 to vector<8x128xf32>
    %9 = arith.mulf %8, %5 : vector<8x128xf32>
    %10 = arith.select %7, %5, %9 : vector<8x128xi1>, vector<8x128xf32>
    %c0_7 = arith.constant 0 : index
    %c0_8 = arith.constant 0 : index
    %11 = vector.load %arg3[%c0_7, %c0_8] : memref<128x128xf32, #tpu.memory_space<vmem>>, vector<128x128xf32>
    %c1 = arith.constant 1 : index
    %c0_9 = arith.constant 0 : index
    %12 = vector.load %arg4[%c1, %c0_9] : memref<2x128xf32, #tpu.memory_space<vmem>>, vector<1x128xf32>
    %cst_10 = arith.constant dense<0.000000e+00> : vector<8x128xf32>
    %13 = tpu.matmul %10, %11, %cst_10 {dimension_numbers = #tpu.dot_dimension_numbers<[1], [0], [0], [1], [0, 0, 1, 1], [], []>} : vector<8x128xf32>, vector<128x128xf32>, vector<8x128xf32> -> vector<8x128xf32>
    %14 = vector.broadcast %12 : vector<1x128xf32> to vector<8x128xf32>
    %15 = arith.addf %13, %14 : vector<8x128xf32>
    %cst_11 = arith.constant 0.000000e+00 : f32
    %16 = vector.broadcast %cst_11 : f32 to vector<8x128xf32>
    %17 = arith.cmpf oge, %15, %16 : vector<8x128xf32>
    %cst_12 = arith.constant -1.000000e-01 : f32
    %18 = vector.broadcast %cst_12 : f32 to vector<8x128xf32>
    %19 = arith.mulf %18, %15 : vector<8x128xf32>
    %20 = arith.select %17, %15, %19 : vector<8x128xi1>, vector<8x128xf32>
    %21 = tpu.iota {dimensions = array<i32: 1>} : vector<8x128xi32>
    %c16_i32 = arith.constant 16 : i32
    %22 = vector.broadcast %c16_i32 : i32 to vector<8x128xi32>
    %23 = arith.cmpi slt, %21, %22 : vector<8x128xi32>
    %cst_13 = arith.constant 0xFF800000 : f32
    %24 = vector.broadcast %cst_13 : f32 to vector<8x128xf32>
    %25 = arith.select %23, %20, %24 : vector<8x128xi1>, vector<8x128xf32>
    %cst_14 = arith.constant dense<0xFF800000> : vector<8xf32>
    %26 = vector.multi_reduction <maximumf>, %25, %cst_14 [1] : vector<8x128xf32> to vector<8xf32>
    %27 = vector.shape_cast %26 : vector<8xf32> to vector<8x1xf32>
    %28 = vector.broadcast %27 : vector<8x1xf32> to vector<8x128xf32>
    %29 = arith.subf %25, %28 : vector<8x128xf32>
    %30 = math.exp %29 : vector<8x128xf32>
    %cst_15 = arith.constant dense<0.000000e+00> : vector<8xf32>
    %31 = vector.multi_reduction <add>, %30, %cst_15 [1] : vector<8x128xf32> to vector<8xf32>
    %32 = vector.shape_cast %31 : vector<8xf32> to vector<8x1xf32>
    %33 = math.log %32 : vector<8x1xf32>
    %34 = arith.addf %27, %33 : vector<8x1xf32>
    %35 = vector.broadcast %34 : vector<8x1xf32> to vector<8x128xf32>
    %36 = arith.subf %20, %35 : vector<8x128xf32>
    %c0_16 = arith.constant 0 : index
    %c0_17 = arith.constant 0 : index
    %37 = vector.load %arg5[%c0_16, %c0_17] : memref<8x128xf32, #tpu.memory_space<vmem>>, vector<8x128xf32>
    tpu.vector_store %arg5[%c0_16, %c0_17], %36 {strides = array<i32>} : memref<8x128xf32, #tpu.memory_space<vmem>>, vector<8x128xf32>,
    return
  }
  func.func @transform_0(%arg0: i32) -> (i32, i32) {
    %c0_i32 = arith.constant 0 : i32
    %c0_i32_0 = arith.constant 0 : i32
    return %arg0, %c0_i32 : i32, i32
  }
  func.func @transform_1(%arg0: i32) -> (i32, i32) {
    %c0_i32 = arith.constant 0 : i32
    %c0_i32_0 = arith.constant 0 : i32
    %c0_i32_1 = arith.constant 0 : i32
    return %c0_i32, %c0_i32_0 : i32, i32
  }
  func.func @transform_2(%arg0: i32) -> (i32, i32) {
    %c0_i32 = arith.constant 0 : i32
    %c0_i32_0 = arith.constant 0 : i32
    %c0_i32_1 = arith.constant 0 : i32
    return %c0_i32, %c0_i32_0 : i32, i32
  }
  func.func @transform_3(%arg0: i32) -> (i32, i32) {
    %c0_i32 = arith.constant 0 : i32
    %c0_i32_0 = arith.constant 0 : i32
    %c0_i32_1 = arith.constant 0 : i32
    return %c0_i32, %c0_i32_0 : i32, i32
  }
  func.func @transform_4(%arg0: i32) -> (i32, i32) {
    %c0_i32 = arith.constant 0 : i32
    %c0_i32_0 = arith.constant 0 : i32
    return %arg0, %c0_i32 : i32, i32
  }
}

</mosaic_0001>

<bundles_post_ra>
// kernel: full_network_forward.1
= control target key start
LH: loop header
LB: loop body
LE: loop exit
PB: predicated region body
PF: predicated region fallthrough
CT: control target
= control target key end

     0   :  { %9 = vsyncpa [#allocation3], 0  ;;  %s343_s0 = inlined_call_operand.hbm [shape: f32[8,128], index: 0, kind: input, shape index: {}]   ;;  %s344_s1 = inlined_call_operand.hbm [shape: f32[128,128], index: 1, kind: input, shape index: {}]   ;;  %s345_s2 = inlined_call_operand.hbm [shape: f32[128,128], index: 2, kind: input, shape index: {}]   ;;  %s346_s3 = inlined_call_operand.vmem [shape: f32[2,128], index: 3, kind: input, shape index: {}]   ;;  %s347_s4 = inlined_call_operand.hbm [shape: f32[8,128], index: 4, kind: output, shape index: {}]  }
   0x1   :  { %10 = vsyncpa [#allocation6], 0  ;;  %s27_s17 = sshll.u32 %s344_s1, 4  ;;  %s28_s17 = int_to_ptr.hbm [resolvable:$true] %s27_s17 }
   0x2   :  { %11 = vsyncpa [#allocation4], 0  ;;  %s294_s18 = smov [#allocation5]   ;;  %s17_s22 = sshll.u32 %s343_s0, 4  ;;  %s18_s22 = int_to_ptr.hbm [resolvable:$true] %s17_s22 }
   0x3   :  { %s29_s19 = sshll.u32 %s294_s18, 4  ;;  %s295_s23 = smov 128   ;;  %s30_s19 = int_to_ptr.vmem [resolvable:$true] %s29_s19 }
   0x4   :  { %s296_s24 = smov 8   ;;  %s297_s25 = smov [#allocation2]  }
   0x5   :  { %35 = dma.hbm_to_vmem [thread:$0]  %s28_s17, 2048, %s30_s19, [#allocation6], %s295_s23, %s295_s23, %s296_s24  }
   0x6   :  { %s19_s26 = sshll.u32 %s297_s25, 4  ;;  %s40_s29 = sshll.u32 %s345_s2, 4  ;;  %s20_s26 = int_to_ptr.vmem [resolvable:$true] %s19_s26  ;;  %s41_s29 = int_to_ptr.hbm [resolvable:$true] %s40_s29 }
   0x7   :  { %22 = dma.hbm_to_vmem [thread:$0]  %s18_s22, 128, %s20_s26, [#allocation3]  }
   0x8   :  { %s298_s1 = smov [#allocation7]  }
   0x9   :  { %s42_s30 = sshll.u32 %s298_s1, 4  ;;  %s43_s30 = int_to_ptr.vmem [resolvable:$true] %s42_s30 }
   0xa   :  { %48 = dma.hbm_to_vmem [thread:$0]  %s41_s29, 2048, %s43_s30, [#allocation6], %s295_s23, %s295_s23, %s296_s24  }
   0xb   :  { %288 = dma.done.wait [#allocation3], 128  }
   0xc   :  { %289 = vsyncadd [#allocation3], 4294967168 }
   0xd   :  { %290 = dma.done.wait [#allocation6], 4096  }
   0xe   :  { %291 = vsyncadd [#allocation6], 4294963200  ;;  %v79_v0 = vld [vmem:[#allocation5 + $0x78] sm:$0xff]  ;;  %v78_v1 = vld [vmem:[#allocation5 + $0x70] sm:$0xff]  ;;  %v146_v38 = vlaneseq  ;;  %s169_s10 = sshll.u32 %s347_s4, 4  ;;  %s170_s10 = int_to_ptr.hbm [resolvable:$true] %s169_s10 }
   0xf   :  { %82 = vmatpush.msra.mxu0 %v79_v0  ;;  %v77_v2 = vld [vmem:[#allocation5 + $0x68] sm:$0xff]  ;;  %v76_v3 = vld [vmem:[#allocation5 + $0x60] sm:$0xff]  ;;  %v120_v4 = vld [vmem:[#allocation7 + $0x78] sm:$0xff] }
  0x10   :  { %v75_v5 = vld [vmem:[#allocation5 + $0x58] sm:$0xff]  ;;  %123 = vmatpush.msra.mxu1 %v120_v4  ;;  %v119_v6 = vld [vmem:[#allocation7 + $0x70] sm:$0xff]  ;;  %v118_v7 = vld [vmem:[#allocation7 + $0x68] sm:$0xff]  ;;  %v147_v40 = vand.u32 127, %v146_v38 }
  0x11   :  { %83 = vmatpush.msra.mxu0 %v78_v1  ;;  %v74_v8 = vld [vmem:[#allocation5 + $0x50] sm:$0xff]  ;;  %v117_v9 = vld [vmem:[#allocation7 + $0x60] sm:$0xff]  ;;  %v73_v10 = vld [vmem:[#allocation5 + $0x48] sm:$0xff] }
  0x12   :  { %124 = vmatpush.msra.mxu1 %v119_v6  ;;  %v116_v11 = vld [vmem:[#allocation7 + $0x58] sm:$0xff]  ;;  %v72_v12 = vld [vmem:[#allocation5 + $0x40] sm:$0xff]  ;;  %v115_v13 = vld [vmem:[#allocation7 + $0x50] sm:$0xff]  ;;  %vm148_vm2 = vcmp.lt.s32.totalorder %v147_v40, 16 }
  0x13   :  { %84 = vmatpush.msra.mxu0 %v77_v2  ;;  %v71_v14 = vld [vmem:[#allocation5 + $0x38] sm:$0xff]  ;;  %v114_v15 = vld [vmem:[#allocation7 + $0x48] sm:$0xff]  ;;  %v70_v16 = vld [vmem:[#allocation5 + $0x30] sm:$0xff] }
  0x14   :  { %125 = vmatpush.msra.mxu1 %v118_v7  ;;  %v113_v17 = vld [vmem:[#allocation7 + $0x40] sm:$0xff]  ;;  %v69_v18 = vld [vmem:[#allocation5 + $0x28] sm:$0xff]  ;;  %v112_v19 = vld [vmem:[#allocation7 + $0x38] sm:$0xff] }
  0x15   :  { %85 = vmatpush.msra.mxu0 %v76_v3  ;;  %v68_v20 = vld [vmem:[#allocation5 + $0x20] sm:$0xff]  ;;  %v111_v21 = vld [vmem:[#allocation7 + $0x30] sm:$0xff]  ;;  %v67_v22 = vld [vmem:[#allocation5 + $0x18] sm:$0xff] }
  0x16   :  { %126 = vmatpush.msra.mxu1 %v117_v9  ;;  %v110_v23 = vld [vmem:[#allocation7 + $0x28] sm:$0xff]  ;;  %v66_v24 = vld [vmem:[#allocation5 + $0x10] sm:$0xff]  ;;  %v109_v25 = vld [vmem:[#allocation7 + $0x20] sm:$0xff] }
  0x17   :  { %86 = vmatpush.msra.mxu0 %v75_v5  ;;  %v65_v26 = vld [vmem:[#allocation5 + $0x8] sm:$0xff]  ;;  %v108_v27 = vld [vmem:[#allocation7 + $0x18] sm:$0xff]  ;;  %v64_v28 = vld [vmem:[#allocation5] sm:$0xff] }
  0x18   :  { %127 = vmatpush.msra.mxu1 %v116_v11  ;;  %v63_v29 = vld [vmem:[#allocation2] sm:$0xff]  ;;  %v107_v30 = vld [vmem:[#allocation7 + $0x10] sm:$0xff]  ;;  %v106_v31 = vld [vmem:[#allocation7 + $0x8] sm:$0xff] }
  0x19   :  { %87 = vmatpush.msra.mxu0 %v74_v8  ;;  %v105_v32 = vld [vmem:[#allocation7] sm:$0xff]  ;;  %v186_v33 = vld [vmem:[%s346_s3] ss:$0 sm:$0xff]  ;;  %v187_v39 = vld [vmem:[%s346_s3 + $0x1] ss:$0 sm:$0xff]  ;;  %s299_s3 = smov [#allocation8]  }
  0x1a   :  { %128 = vmatpush.msra.mxu1 %v115_v13  ;;  %s167_s7 = sshll.u32 %s299_s3, 4  ;;  %s168_s7 = int_to_ptr.vmem [resolvable:$true] %s167_s7 }
  0x1b   :  { %88 = vmatpush.msra.mxu0 %v73_v10 }
  0x1c   :  { %129 = vmatpush.msra.mxu1 %v114_v15 }
  0x1d   :  { %89 = vmatpush.msra.mxu0 %v72_v12 }
  0x1e   :  { %130 = vmatpush.msra.mxu1 %v113_v17 }
  0x1f   :  { %90 = vmatpush.msra.mxu0 %v71_v14 }
  0x20   :  { %131 = vmatpush.msra.mxu1 %v112_v19 }
  0x21   :  { %91 = vmatpush.msra.mxu0 %v70_v16 }
  0x22   :  { %132 = vmatpush.msra.mxu1 %v111_v21 }
  0x23   :  { %92 = vmatpush.msra.mxu0 %v69_v18 }
  0x24   :  { %133 = vmatpush.msra.mxu1 %v110_v23 }
  0x25   :  { %93 = vmatpush.msra.mxu0 %v68_v20 }
  0x26   :  { %134 = vmatpush.msra.mxu1 %v109_v25 }
  0x27   :  { %94 = vmatpush.msra.mxu0 %v67_v22 }
  0x28   :  { %135 = vmatpush.msra.mxu1 %v108_v27 }
  0x29   :  { %95 = vmatpush.msra.mxu0 %v66_v24 }
  0x2a   :  { %136 = vmatpush.msra.mxu1 %v107_v30 }
  0x2b   :  { %96 = vmatpush.msra.mxu0 %v65_v26 }
  0x2c   :  { %137 = vmatpush.msra.mxu1 %v106_v31 }
  0x2d   :  { %97 = vmatpush.msra.mxu0 %v64_v28 }
  0x2e   :  { %98 = vmatmul.f32.vlgmr.msra.gmra.mxu0 %v63_v29  ;;  %138 = vmatpush.msra.mxu1 %v105_v32 }
  0xab   :  { %v99_v34 = vpop.f32.mrf.mxu0 }
  0xac   :  { %v100_v35 = vadd.f32 %v186_v33, %v99_v34 }
  0xae   :  { %vm102_vm0 = vcmp.ge.f32.partialorder %v100_v35, 0.0  ;;  %v103_v36 = vmul.f32 -0.1, %v100_v35 }
  0xb0   :  { %v104_v37 = vsel %vm102_vm0, %v100_v35, %v103_v36 }
  0xb1   :  { %139 = vmatmul.f32.vlgmr.msra.gmra.mxu1 %v104_v37 }
 0x12e   :  { %v140_v41 = vpop.f32.mrf.mxu1 }
 0x12f   :  { %v141_v42 = vadd.f32 %v187_v39, %v140_v41 }
 0x131   :  { %v144_v43 = vmul.f32 -0.1, %v141_v42  ;;  %vm143_vm1 = vcmp.ge.f32.partialorder %v141_v42, 0.0 }
 0x133   :  { %v145_v44 = vsel %vm143_vm1, %v141_v42, %v144_v43 }
 0x134   :  { %v149_v45 = vsel %vm148_vm2, %v145_v44, -inf }
 0x135   :  { %150 = vmax.xlane.f32.xlu0 %v149_v45 }
 0x1a8   :  { %v151_v46 = vpop.xlane.xlu0 %150 }
 0x1a9   :  { %v152_v47 = vsub.f32 %v149_v45, %v151_v46 }
 0x1ab   :  { %v153_v48 = vmul.f32 1.442695, %v152_v47 }
 0x1ad   :  { %188 = vpow2.f32 %v153_v48 }
 0x1b3   :  { %v189_v49 = vpop.eup %188 }
 0x1b4   :  { %155 = vadd.xlane.f32.xlu0 %v189_v49 }
 0x227   :  { %v156_v50 = vpop.xlane.xlu0 %155 }
 0x228   :  { %190 = vlog2.f32 %v156_v50 }
 0x22e   :  { %v191_v51 = vpop.eup %190 }
 0x22f   :  { %v158_v52 = vmul.f32 0.6931472, %v191_v51 }
 0x231   :  { %v159_v53 = vadd.f32 %v158_v52, %v151_v46 }
 0x233   :  { %v160_v54 = vsub.f32 %v145_v44, %v159_v53 }
 0x235   :  { %161 = vst [vmem:[#allocation8] sm:$0xff] %v160_v54 }
 0x236   :  { %172 = dma.vmem_to_hbm [thread:$0]  %s168_s7, 128, %s170_s10, [#allocation4]  }
 0x237   :  { %292 = dma.done.wait [#allocation4], 128  }
 0x238   :  { %293 = vsyncadd [#allocation4], 4294967168 }
 0x239   :  { %177 = vsyncpa [#allocation3], 1 }
 0x23a   :  { %178 = vsyncpa [#allocation6], 1 }
 0x23b   :  { %179 = vsyncpa [#allocation4], 1 }

// kernel: full_network_forward.1
= control target key start
LH: loop header
LB: loop body
LE: loop exit
PB: predicated region body
PF: predicated region fallthrough
CT: control target
= control target key end

     0   :  { %9 = vsyncpa [#allocation3], 0  ;;  %s343_s0 = inlined_call_operand.hbm [shape: f32[8,128], index: 0, kind: input, shape index: {}]   ;;  %s344_s1 = inlined_call_operand.hbm [shape: f32[128,128], index: 1, kind: input, shape index: {}]   ;;  %s345_s2 = inlined_call_operand.hbm [shape: f32[128,128], index: 2, kind: input, shape index: {}]   ;;  %s346_s3 = inlined_call_operand.vmem [shape: f32[2,128], index: 3, kind: input, shape index: {}]   ;;  %s347_s4 = inlined_call_operand.hbm [shape: f32[8,128], index: 4, kind: output, shape index: {}]  }
   0x1   :  { %10 = vsyncpa [#allocation6], 0  ;;  %s27_s17 = sshll.u32 %s344_s1, 4  ;;  %s28_s17 = int_to_ptr.hbm [resolvable:$true] %s27_s17 }
   0x2   :  { %11 = vsyncpa [#allocation4], 0  ;;  %s294_s18 = smov [#allocation5]   ;;  %s17_s22 = sshll.u32 %s343_s0, 4  ;;  %s18_s22 = int_to_ptr.hbm [resolvable:$true] %s17_s22 }
   0x3   :  { %s29_s19 = sshll.u32 %s294_s18, 4  ;;  %s295_s23 = smov 128   ;;  %s30_s19 = int_to_ptr.vmem [resolvable:$true] %s29_s19 }
   0x4   :  { %s296_s24 = smov 8   ;;  %s297_s25 = smov [#allocation2]  }
   0x5   :  { %35 = dma.hbm_to_vmem [thread:$0]  %s28_s17, 2048, %s30_s19, [#allocation6], %s295_s23, %s295_s23, %s296_s24  }
   0x6   :  { %s19_s26 = sshll.u32 %s297_s25, 4  ;;  %s40_s29 = sshll.u32 %s345_s2, 4  ;;  %s20_s26 = int_to_ptr.vmem [resolvable:$true] %s19_s26  ;;  %s41_s29 = int_to_ptr.hbm [resolvable:$true] %s40_s29 }
   0x7   :  { %22 = dma.hbm_to_vmem [thread:$0]  %s18_s22, 128, %s20_s26, [#allocation3]  }
   0x8   :  { %s298_s1 = smov [#allocation7]  }
   0x9   :  { %s42_s30 = sshll.u32 %s298_s1, 4  ;;  %s43_s30 = int_to_ptr.vmem [resolvable:$true] %s42_s30 }
   0xa   :  { %48 = dma.hbm_to_vmem [thread:$0]  %s41_s29, 2048, %s43_s30, [#allocation6], %s295_s23, %s295_s23, %s296_s24  }
   0xb   :  { %288 = dma.done.wait [#allocation3], 128  }
   0xc   :  { %289 = vsyncadd [#allocation3], 4294967168 }
   0xd   :  { %290 = dma.done.wait [#allocation6], 4096  }
   0xe   :  { %291 = vsyncadd [#allocation6], 4294963200  ;;  %v79_v0 = vld [vmem:[#allocation5 + $0x78] sm:$0xff]  ;;  %v78_v1 = vld [vmem:[#allocation5 + $0x70] sm:$0xff]  ;;  %v146_v38 = vlaneseq  ;;  %s169_s10 = sshll.u32 %s347_s4, 4  ;;  %s170_s10 = int_to_ptr.hbm [resolvable:$true] %s169_s10 }
   0xf   :  { %82 = vmatpush.msra.mxu0 %v79_v0  ;;  %v77_v2 = vld [vmem:[#allocation5 + $0x68] sm:$0xff]  ;;  %v76_v3 = vld [vmem:[#allocation5 + $0x60] sm:$0xff]  ;;  %v120_v4 = vld [vmem:[#allocation7 + $0x78] sm:$0xff] }
  0x10   :  { %v75_v5 = vld [vmem:[#allocation5 + $0x58] sm:$0xff]  ;;  %123 = vmatpush.msra.mxu1 %v120_v4  ;;  %v119_v6 = vld [vmem:[#allocation7 + $0x70] sm:$0xff]  ;;  %v118_v7 = vld [vmem:[#allocation7 + $0x68] sm:$0xff]  ;;  %v147_v40 = vand.u32 127, %v146_v38 }
  0x11   :  { %83 = vmatpush.msra.mxu0 %v78_v1  ;;  %v74_v8 = vld [vmem:[#allocation5 + $0x50] sm:$0xff]  ;;  %v117_v9 = vld [vmem:[#allocation7 + $0x60] sm:$0xff]  ;;  %v73_v10 = vld [vmem:[#allocation5 + $0x48] sm:$0xff] }
  0x12   :  { %124 = vmatpush.msra.mxu1 %v119_v6  ;;  %v116_v11 = vld [vmem:[#allocation7 + $0x58] sm:$0xff]  ;;  %v72_v12 = vld [vmem:[#allocation5 + $0x40] sm:$0xff]  ;;  %v115_v13 = vld [vmem:[#allocation7 + $0x50] sm:$0xff]  ;;  %vm148_vm2 = vcmp.lt.s32.totalorder %v147_v40, 16 }
  0x13   :  { %84 = vmatpush.msra.mxu0 %v77_v2  ;;  %v71_v14 = vld [vmem:[#allocation5 + $0x38] sm:$0xff]  ;;  %v114_v15 = vld [vmem:[#allocation7 + $0x48] sm:$0xff]  ;;  %v70_v16 = vld [vmem:[#allocation5 + $0x30] sm:$0xff] }
  0x14   :  { %125 = vmatpush.msra.mxu1 %v118_v7  ;;  %v113_v17 = vld [vmem:[#allocation7 + $0x40] sm:$0xff]  ;;  %v69_v18 = vld [vmem:[#allocation5 + $0x28] sm:$0xff]  ;;  %v112_v19 = vld [vmem:[#allocation7 + $0x38] sm:$0xff] }
  0x15   :  { %85 = vmatpush.msra.mxu0 %v76_v3  ;;  %v68_v20 = vld [vmem:[#allocation5 + $0x20] sm:$0xff]  ;;  %v111_v21 = vld [vmem:[#allocation7 + $0x30] sm:$0xff]  ;;  %v67_v22 = vld [vmem:[#allocation5 + $0x18] sm:$0xff] }
  0x16   :  { %126 = vmatpush.msra.mxu1 %v117_v9  ;;  %v110_v23 = vld [vmem:[#allocation7 + $0x28] sm:$0xff]  ;;  %v66_v24 = vld [vmem:[#allocation5 + $0x10] sm:$0xff]  ;;  %v109_v25 = vld [vmem:[#allocation7 + $0x20] sm:$0xff] }
  0x17   :  { %86 = vmatpush.msra.mxu0 %v75_v5  ;;  %v65_v26 = vld [vmem:[#allocation5 + $0x8] sm:$0xff]  ;;  %v108_v27 = vld [vmem:[#allocation7 + $0x18] sm:$0xff]  ;;  %v64_v28 = vld [vmem:[#allocation5] sm:$0xff] }
  0x18   :  { %127 = vmatpush.msra.mxu1 %v116_v11  ;;  %v63_v29 = vld [vmem:[#allocation2] sm:$0xff]  ;;  %v107_v30 = vld [vmem:[#allocation7 + $0x10] sm:$0xff]  ;;  %v106_v31 = vld [vmem:[#allocation7 + $0x8] sm:$0xff] }
  0x19   :  { %87 = vmatpush.msra.mxu0 %v74_v8  ;;  %v105_v32 = vld [vmem:[#allocation7] sm:$0xff]  ;;  %v186_v33 = vld [vmem:[%s346_s3] ss:$0 sm:$0xff]  ;;  %v187_v39 = vld [vmem:[%s346_s3 + $0x1] ss:$0 sm:$0xff]  ;;  %s299_s3 = smov [#allocation8]  }
  0x1a   :  { %128 = vmatpush.msra.mxu1 %v115_v13  ;;  %s167_s7 = sshll.u32 %s299_s3, 4  ;;  %s168_s7 = int_to_ptr.vmem [resolvable:$true] %s167_s7 }
  0x1b   :  { %88 = vmatpush.msra.mxu0 %v73_v10 }
  0x1c   :  { %129 = vmatpush.msra.mxu1 %v114_v15 }
  0x1d   :  { %89 = vmatpush.msra.mxu0 %v72_v12 }
  0x1e   :  { %130 = vmatpush.msra.mxu1 %v113_v17 }
  0x1f   :  { %90 = vmatpush.msra.mxu0 %v71_v14 }
  0x20   :  { %131 = vmatpush.msra.mxu1 %v112_v19 }
  0x21   :  { %91 = vmatpush.msra.mxu0 %v70_v16 }
  0x22   :  { %132 = vmatpush.msra.mxu1 %v111_v21 }
  0x23   :  { %92 = vmatpush.msra.mxu0 %v69_v18 }
  0x24   :  { %133 = vmatpush.msra.mxu1 %v110_v23 }
  0x25   :  { %93 = vmatpush.msra.mxu0 %v68_v20 }
  0x26   :  { %134 = vmatpush.msra.mxu1 %v109_v25 }
  0x27   :  { %94 = vmatpush.msra.mxu0 %v67_v22 }
  0x28   :  { %135 = vmatpush.msra.mxu1 %v108_v27 }
  0x29   :  { %95 = vmatpush.msra.mxu0 %v66_v24 }
  0x2a   :  { %136 = vmatpush.msra.mxu1 %v107_v30 }
  0x2b   :  { %96 = vmatpush.msra.mxu0 %v65_v26 }
  0x2c   :  { %137 = vmatpush.msra.mxu1 %v106_v31 }
  0x2d   :  { %97 = vmatpush.msra.mxu0 %v64_v28 }
  0x2e   :  { %98 = vmatmul.f32.vlgmr.msra.gmra.mxu0 %v63_v29  ;;  %138 = vmatpush.msra.mxu1 %v105_v32 }
  0xab   :  { %v99_v34 = vpop.f32.mrf.mxu0 }
  0xac   :  { %v100_v35 = vadd.f32 %v186_v33, %v99_v34 }
  0xae   :  { %vm102_vm0 = vcmp.ge.f32.partialorder %v100_v35, 0.0  ;;  %v103_v36 = vmul.f32 -0.1, %v100_v35 }
  0xb0   :  { %v104_v37 = vsel %vm102_vm0, %v100_v35, %v103_v36 }
  0xb1   :  { %139 = vmatmul.f32.vlgmr.msra.gmra.mxu1 %v104_v37 }
 0x12e   :  { %v140_v41 = vpop.f32.mrf.mxu1 }
 0x12f   :  { %v141_v42 = vadd.f32 %v187_v39, %v140_v41 }
 0x131   :  { %v144_v43 = vmul.f32 -0.1, %v141_v42  ;;  %vm143_vm1 = vcmp.ge.f32.partialorder %v141_v42, 0.0 }
 0x133   :  { %v145_v44 = vsel %vm143_vm1, %v141_v42, %v144_v43 }
 0x134   :  { %v149_v45 = vsel %vm148_vm2, %v145_v44, -inf }
 0x135   :  { %150 = vmax.xlane.f32.xlu0 %v149_v45 }
 0x1a8   :  { %v151_v46 = vpop.xlane.xlu0 %150 }
 0x1a9   :  { %v152_v47 = vsub.f32 %v149_v45, %v151_v46 }
 0x1ab   :  { %v153_v48 = vmul.f32 1.442695, %v152_v47 }
 0x1ad   :  { %188 = vpow2.f32 %v153_v48 }
 0x1b3   :  { %v189_v49 = vpop.eup %188 }
 0x1b4   :  { %155 = vadd.xlane.f32.xlu0 %v189_v49 }
 0x227   :  { %v156_v50 = vpop.xlane.xlu0 %155 }
 0x228   :  { %190 = vlog2.f32 %v156_v50 }
 0x22e   :  { %v191_v51 = vpop.eup %190 }
 0x22f   :  { %v158_v52 = vmul.f32 0.6931472, %v191_v51 }
 0x231   :  { %v159_v53 = vadd.f32 %v158_v52, %v151_v46 }
 0x233   :  { %v160_v54 = vsub.f32 %v145_v44, %v159_v53 }
 0x235   :  { %161 = vst [vmem:[#allocation8] sm:$0xff] %v160_v54 }
 0x236   :  { %172 = dma.vmem_to_hbm [thread:$0]  %s168_s7, 128, %s170_s10, [#allocation4]  }
 0x237   :  { %292 = dma.done.wait [#allocation4], 128  }
 0x238   :  { %293 = vsyncadd [#allocation4], 4294967168 }
 0x239   :  { %177 = vsyncpa [#allocation3], 1 }
 0x23a   :  { %178 = vsyncpa [#allocation6], 1 }
 0x23b   :  { %179 = vsyncpa [#allocation4], 1 }

</bundles_post_ra>
